<compile_context>
chip_gen: v6e
topology: v6e:2x2x1
jax: 0.10.0
libtpu: 0.0.40
codegen_flags: <defaults>
</compile_context>

<pallas_src>
import jax
import jax.numpy as jnp
from jax.experimental import pallas as pl
from jax.experimental.pallas import tpu as pltpu


def _round_up(x, m):
    return (x + m - 1) // m * m


def _mlp_kernel(x_ref, w1_ref, b1_ref, w2_ref, b2_ref, o_ref):
    # hidden = tanh(x @ W1 + b1)    (bf16 MXU, f32 accumulate, f32 epilogue)
    x = x_ref[...]
    h = jnp.dot(x, w1_ref[...], preferred_element_type=jnp.float32)
    h = jnp.tanh(h + b1_ref[...])
    # output = sigmoid(h @ W2 + b2)
    o = jnp.dot(h.astype(w2_ref.dtype), w2_ref[...],
                preferred_element_type=jnp.float32)
    o = jax.nn.sigmoid(o + b2_ref[...])
    o_ref[...] = o.astype(o_ref.dtype)


def prepare_mlp_params(w1, b1, w2, b2, compute_dtype=jnp.bfloat16):
    """One-time param prep (do NOT call per forward):
    transpose to (in, out), zero-pad feature dims to multiples of 128,
    cast weights to bf16, keep biases in f32 as (1, dim) lane-major rows.

    w1: (H, I); b1: (H,); w2: (O, H); b2: (O,)   (PyTorch nn.Linear layout).
    """
    H, I = w1.shape
    O, H2 = w2.shape
    assert H2 == H
    I_p, H_p, O_p = _round_up(I, 128), _round_up(H, 128), _round_up(O, 128)

    w1_t = jnp.zeros((I_p, H_p), compute_dtype).at[:I, :H].set(
        jnp.transpose(w1).astype(compute_dtype))
    w2_t = jnp.zeros((H_p, O_p), compute_dtype).at[:H, :O].set(
        jnp.transpose(w2).astype(compute_dtype))
    b1_p = jnp.zeros((1, H_p), jnp.float32).at[0, :H].set(b1.astype(jnp.float32))
    b2_p = jnp.zeros((1, O_p), jnp.float32).at[0, :O].set(b2.astype(jnp.float32))

    return {
        "w1": w1_t, "b1": b1_p, "w2": w2_t, "b2": b2_p,
        "dims": (I, H, O),
        "compute_dtype": compute_dtype,
    }


def mlp_forward(x, params, *, tb=128):
    """x: (B, I) float32; params: output of prepare_mlp_params. Returns (B, O) f32."""
    I, H, O = params["dims"]
    w1_t, b1_p, w2_t, b2_p = params["w1"], params["b1"], params["w2"], params["b2"]
    cdt = params["compute_dtype"]
    I_p, H_p = w1_t.shape
    O_p = w2_t.shape[1]

    B = x.shape[0]
    assert x.shape[1] == I

    # Pad batch to a multiple of the batch tile and features to the lane-dense
    # padded width; padded rows/cols are inert and sliced off below.
    pB = _round_up(B, tb)
    x_p = jnp.zeros((pB, I_p), cdt).at[:B, :I].set(x.astype(cdt))

    # VMEM budget (double-buffered tiles + resident weights) with headroom,
    # clamped to v7x's 64 MiB physical VMEM.
    itm_x, itm_o, itm_w = jnp.dtype(cdt).itemsize, 4, jnp.dtype(cdt).itemsize
    vmem_bytes = (2 * tb * I_p * itm_x + 2 * tb * O_p * itm_o
                  + 2 * (I_p * H_p + H_p * O_p) * itm_w
                  + 2 * (H_p + O_p) * 4 + (4 << 20))
    vmem_limit = int(min(max(vmem_bytes, 16 << 20), 64 << 20))

    out_p = pl.pallas_call(
        _mlp_kernel,
        out_shape=jax.ShapeDtypeStruct((pB, O_p), jnp.float32),
        grid_spec=pltpu.PrefetchScalarGridSpec(
            num_scalar_prefetch=0,
            grid=(pl.cdiv(pB, tb),),
            in_specs=[
                pl.BlockSpec((tb, I_p), lambda i: (i, 0)),   # x tile moves
                pl.BlockSpec((I_p, H_p), lambda i: (0, 0)),  # W1 resident
                pl.BlockSpec((1, H_p), lambda i: (0, 0)),    # b1 resident
                pl.BlockSpec((H_p, O_p), lambda i: (0, 0)),  # W2 resident
                pl.BlockSpec((1, O_p), lambda i: (0, 0)),    # b2 resident
            ],
            out_specs=pl.BlockSpec((tb, O_p), lambda i: (i, 0)),
        ),
        compiler_params=pltpu.CompilerParams(
            dimension_semantics=("parallel",),   # megacore-shardable on v7x
            vmem_limit_bytes=vmem_limit,
        ),
    )(x_p, w1_t, b1_p, w2_t, b2_p)

    return out_p[:B, :O]


def _init_linear_params(key, in_features, out_features):
    """Deterministic init mimicking nn.Linear's uniform(-1/sqrt(fan_in), ...)."""
    kw, kb = jax.random.split(key)
    bound = 1.0 / jnp.sqrt(jnp.float32(in_features))
    w = jax.random.uniform(kw, (out_features, in_features), jnp.float32, -bound, bound)
    b = jax.random.uniform(kb, (out_features,), jnp.float32, -bound, bound)
    return w, b


if __name__ == "__main__":
    # Small shapes consistent with the module: batch=8, input=32, hidden=64, output=16.
    # (At these demo sizes the pallas_call fixed cost dominates; the tiling only
    #  pays off at production batch sizes >= a few hundred rows.)
    B, INPUT, HIDDEN, OUTPUT = 8, 32, 64, 16

    key = jax.random.PRNGKey(0)
    kx, k1, k2 = jax.random.split(key, 3)

    x = jax.random.normal(kx, (B, INPUT), jnp.float32)
    w1, b1 = _init_linear_params(k1, INPUT, HIDDEN)
    w2, b2 = _init_linear_params(k2, HIDDEN, OUTPUT)

    params = prepare_mlp_params(w1, b1, w2, b2)       # one-time prep
    out = mlp_forward(x, params)
    out = jax.block_until_ready(out)

    # Reference check in plain JAX (same math as the PyTorch forward, f32).
    ref = jax.nn.sigmoid(jnp.tanh(x @ w1.T + b1) @ w2.T + b2)
    assert out.shape == (B, OUTPUT)
    # bf16 MXU inputs => loosened tolerance vs. pure-f32 reference.
    assert jnp.allclose(out, ref, atol=2e-2, rtol=2e-2)

    print("KERNEL_OK")
</pallas_src>

<mosaic_0001>
module attributes {stable_mosaic.version = 11 : i64} {
  func.func @_mlp_kernel(%arg0: i32, %arg1: memref<128x128xbf16, #tpu.memory_space<vmem>>, %arg2: memref<128x128xbf16, #tpu.memory_space<vmem>>, %arg3: memref<1x128xf32, #tpu.memory_space<vmem>>, %arg4: memref<128x128xbf16, #tpu.memory_space<vmem>>, %arg5: memref<1x128xf32, #tpu.memory_space<vmem>>, %arg6: memref<128x128xf32, #tpu.memory_space<vmem>>) attributes {dimension_semantics = [#tpu.dimension_semantics<parallel>], iteration_bounds = array<i64: 1>, scalar_prefetch = 0 : i64, scratch_operands = 0 : i64, tpu.core_type = #tpu.core_type<tc>, window_params = [{transform_indices = @transform_0, window_bounds = array<i64: 128, 128>}, {pipeline_mode = #tpu.pipeline_mode<synchronous>, transform_indices = @transform_1, window_bounds = array<i64: 128, 128>}, {pipeline_mode = #tpu.pipeline_mode<synchronous>, transform_indices = @transform_2, window_bounds = array<i64: 1, 128>}, {pipeline_mode = #tpu.pipeline_mode<synchronous>, transform_indices = @transform_3, window_bounds = array<i64: 128, 128>}, {pipeline_mode = #tpu.pipeline_mode<synchronous>, transform_indices = @transform_4, window_bounds = array<i64: 1, 128>}, {transform_indices = @transform_5, window_bounds = array<i64: 128, 128>}]} {
    %c0 = arith.constant 0 : index
    %c0_0 = arith.constant 0 : index
    %0 = vector.load %arg1[%c0, %c0_0] : memref<128x128xbf16, #tpu.memory_space<vmem>>, vector<128x128xbf16>
    %c0_1 = arith.constant 0 : index
    %c0_2 = arith.constant 0 : index
    %1 = vector.load %arg2[%c0_1, %c0_2] : memref<128x128xbf16, #tpu.memory_space<vmem>>, vector<128x128xbf16>
    %cst = arith.constant dense<0.000000e+00> : vector<128x128xf32>
    %2 = tpu.matmul %0, %1, %cst {dimension_numbers = #tpu.dot_dimension_numbers<[1], [0], [0], [1], [0, 0, 1, 1], [], []>} : vector<128x128xbf16>, vector<128x128xbf16>, vector<128x128xf32> -> vector<128x128xf32>
    %c0_3 = arith.constant 0 : index
    %c0_4 = arith.constant 0 : index
    %3 = vector.load %arg3[%c0_3, %c0_4] : memref<1x128xf32, #tpu.memory_space<vmem>>, vector<1x128xf32>
    %4 = vector.broadcast %3 : vector<1x128xf32> to vector<128x128xf32>
    %5 = arith.addf %2, %4 : vector<128x128xf32>
    %6 = math.tanh %5 : vector<128x128xf32>
    %7 = arith.truncf %6 : vector<128x128xf32> to vector<128x128xbf16>
    %c0_5 = arith.constant 0 : index
    %c0_6 = arith.constant 0 : index
    %8 = vector.load %arg4[%c0_5, %c0_6] : memref<128x128xbf16, #tpu.memory_space<vmem>>, vector<128x128xbf16>
    %cst_7 = arith.constant dense<0.000000e+00> : vector<128x128xf32>
    %9 = tpu.matmul %7, %8, %cst_7 {dimension_numbers = #tpu.dot_dimension_numbers<[1], [0], [0], [1], [0, 0, 1, 1], [], []>} : vector<128x128xbf16>, vector<128x128xbf16>, vector<128x128xf32> -> vector<128x128xf32>
    %c0_8 = arith.constant 0 : index
    %c0_9 = arith.constant 0 : index
    %10 = vector.load %arg5[%c0_8, %c0_9] : memref<1x128xf32, #tpu.memory_space<vmem>>, vector<1x128xf32>
    %11 = vector.broadcast %10 : vector<1x128xf32> to vector<128x128xf32>
    %12 = arith.addf %9, %11 : vector<128x128xf32>
    %13 = arith.negf %12 : vector<128x128xf32>
    %14 = math.exp %13 : vector<128x128xf32>
    %cst_10 = arith.constant 1.000000e+00 : f32
    %15 = vector.broadcast %cst_10 : f32 to vector<128x128xf32>
    %16 = arith.addf %15, %14 : vector<128x128xf32>
    %17 = arith.divf %15, %16 : vector<128x128xf32>
    %c0_11 = arith.constant 0 : index
    %c0_12 = arith.constant 0 : index
    %18 = vector.load %arg6[%c0_11, %c0_12] : memref<128x128xf32, #tpu.memory_space<vmem>>, vector<128x128xf32>
    tpu.vector_store %arg6[%c0_11, %c0_12], %17 {strides = array<i32>} : memref<128x128xf32, #tpu.memory_space<vmem>>, vector<128x128xf32>,
    return
  }
  func.func @transform_0(%arg0: i32) -> (i32, i32) {
    %c0_i32 = arith.constant 0 : i32
    %c0_i32_0 = arith.constant 0 : i32
    return %arg0, %c0_i32 : i32, i32
  }
  func.func @transform_1(%arg0: i32) -> (i32, i32) {
    %c0_i32 = arith.constant 0 : i32
    %c0_i32_0 = arith.constant 0 : i32
    %c0_i32_1 = arith.constant 0 : i32
    return %c0_i32, %c0_i32_0 : i32, i32
  }
  func.func @transform_2(%arg0: i32) -> (i32, i32) {
    %c0_i32 = arith.constant 0 : i32
    %c0_i32_0 = arith.constant 0 : i32
    %c0_i32_1 = arith.constant 0 : i32
    return %c0_i32, %c0_i32_0 : i32, i32
  }
  func.func @transform_3(%arg0: i32) -> (i32, i32) {
    %c0_i32 = arith.constant 0 : i32
    %c0_i32_0 = arith.constant 0 : i32
    %c0_i32_1 = arith.constant 0 : i32
    return %c0_i32, %c0_i32_0 : i32, i32
  }
  func.func @transform_4(%arg0: i32) -> (i32, i32) {
    %c0_i32 = arith.constant 0 : i32
    %c0_i32_0 = arith.constant 0 : i32
    %c0_i32_1 = arith.constant 0 : i32
    return %c0_i32, %c0_i32_0 : i32, i32
  }
  func.func @transform_5(%arg0: i32) -> (i32, i32) {
    %c0_i32 = arith.constant 0 : i32
    %c0_i32_0 = arith.constant 0 : i32
    return %arg0, %c0_i32 : i32, i32
  }
}

</mosaic_0001>

<bundles_post_ra>
// kernel: tpu_custom_call.1
= control target key start
LH: loop header
LB: loop body
LE: loop exit
PB: predicated region body
PF: predicated region fallthrough
CT: control target
= control target key end

     0   :  { %10 = vsyncpa [#allocation3], 0  ;;  %s1043_s0 = inlined_call_operand.hbm [shape: bf16[128,128], index: 0, kind: input, shape index: {}]   ;;  %s1044_s1 = inlined_call_operand.hbm [shape: bf16[128,128], index: 1, kind: input, shape index: {}]   ;;  %s1045_s2 = inlined_call_operand.vmem [shape: f32[1,128], index: 2, kind: input, shape index: {}]   ;;  %s1046_s3 = inlined_call_operand.hbm [shape: bf16[128,128], index: 3, kind: input, shape index: {}]   ;;  %s1047_s4 = inlined_call_operand.vmem [shape: f32[1,128], index: 4, kind: input, shape index: {}]   ;;  %s1048_s5 = inlined_call_operand.hbm [shape: f32[128,128], index: 5, kind: output, shape index: {}]  }
   0x1   :  { %11 = vsyncpa [#allocation6], 0 }
   0x2   :  { %12 = vsyncpa [#allocation4], 0  ;;  %s969_s18 = smov [#allocation5]   ;;  %s970_s20 = smov [#allocation2]  }
   0x3   :  { %s30_s19 = sshll.u32 %s969_s18, 4  ;;  %s18_s21 = sshll.u32 %s970_s20, 4  ;;  %s31_s19 = int_to_ptr.vmem [resolvable:$true] %s30_s19  ;;  %s19_s21 = int_to_ptr.vmem [resolvable:$true] %s18_s21 }
   0x4   :  { %s891_s22 = scalar_lea.vmem %s31_s19, 1024  ;;  %p896_p1 = scmp.lt.s32.totalorder %s31_s19, %s31_s19 }
   0x5   :  { %p892_p0 = scmp.ne.s32.totalorder %s31_s19, %s891_s22  ;;  %p897_p2 = scmp.lt.s32.totalorder %s891_s22, %s891_s22 }
   0x7   :  { %p898_p3 = por %p897_p2, %p896_p1 }
   0x9   :  { %p899_p4 = pnand %p898_p3, %p892_p0 }
   0xb   :  { %902 = shalt.err (!%p899_p4)
}
   0xc   :  { %s971_s23 = smov 64   ;;  %s972_s24 = smov 4  }
   0xd   :  { %36 = dma.hbm_to_vmem [thread:$0]  %s1044_s1, 1024, %s31_s19, [#allocation6], %s971_s23, %s971_s23, %s972_s24  }
   0xe   :  { %s911_s27 = scalar_lea.vmem %s19_s21, 1024  ;;  %p916_p6 = scmp.lt.s32.totalorder %s19_s21, %s19_s21 }
   0xf   :  { %p912_p5 = scmp.ne.s32.totalorder %s19_s21, %s911_s27  ;;  %p917_p7 = scmp.lt.s32.totalorder %s911_s27, %s911_s27 }
  0x11   :  { %p918_p8 = por %p917_p7, %p916_p6 }
  0x13   :  { %p919_p9 = pnand %p918_p8, %p912_p5 }
  0x15   :  { %922 = shalt.err (!%p919_p9)
}
  0x16   :  { %24 = dma.hbm_to_vmem [thread:$0]  %s1043_s0, 1024, %s19_s21, [#allocation3], %s971_s23, %s971_s23, %s972_s24  }
  0x17   :  { %s973_s30 = smov [#allocation7]  }
  0x18   :  { %s44_s6 = sshll.u32 %s973_s30, 4  ;;  %s45_s6 = int_to_ptr.vmem [resolvable:$true] %s44_s6 }
  0x19   :  { %s931_s7 = scalar_lea.vmem %s45_s6, 1024  ;;  %p936_p11 = scmp.lt.s32.totalorder %s45_s6, %s45_s6 }
  0x1a   :  { %p932_p10 = scmp.ne.s32.totalorder %s45_s6, %s931_s7  ;;  %p937_p12 = scmp.lt.s32.totalorder %s931_s7, %s931_s7 }
  0x1c   :  { %p938_p13 = por %p937_p12, %p936_p11 }
  0x1e   :  { %p939_p0 = pnand %p938_p13, %p932_p10 }
  0x20   :  { %942 = shalt.err (!%p939_p0)
}
  0x21   :  { %50 = dma.hbm_to_vmem [thread:$0]  %s1046_s3, 1024, %s45_s6, [#allocation6], %s971_s23, %s971_s23, %s972_s24  }
  0x22   :  { %963 = dma.done.wait [#allocation3], 1024  }
  0x23   :  { %964 = vsyncadd [#allocation3], 4294966272 }
  0x24   :  { %965 = dma.done.wait [#allocation6], 2048  }
  0x25   :  { %966 = vsyncadd [#allocation6], 4294965248  ;;  %v763_v0 = vld [vmem:[#allocation5 + $0x38] sm:$0xff]   ;;  %v764_v1 = vld [vmem:[#allocation5 + $0x30] sm:$0xff]  }
  0x26   :  { %691 = vmatprep.subr.bf16.mxu0 %v763_v0  ;;  %v765_v2 = vld [vmem:[#allocation5 + $0x28] sm:$0xff]   ;;  %v766_v3 = vld [vmem:[#allocation5 + $0x20] sm:$0xff]   ;;  %v767_v5 = vld [vmem:[#allocation5 + $0x18] sm:$0xff]  }
  0x27   :  { %692 = vmatpush3.bf16.msra.mxu0 %v763_v0  ;;  %v771_v4 = vld [vmem:[#allocation2] sm:$0xff]   ;;  %v768_v6 = vld [vmem:[#allocation5 + $0x10] sm:$0xff]   ;;  %v779_v7 = vld [vmem:[#allocation7 + $0x38] sm:$0xff]  }
  0x28   :  { %693 = vmatprep.subr.bf16.mxu0 %v764_v1  ;;  %707 = vmatprep.mubr.bf16.mxu0 %v771_v4  ;;  %v780_v8 = vld [vmem:[#allocation7 + $0x30] sm:$0xff]   ;;  %v769_v9 = vld [vmem:[#allocation5 + $0x8] sm:$0xff]   ;;  %v770_v10 = vld [vmem:[#allocation5] sm:$0xff]  }
  0x29   :  { %723 = vmatprep.subr.bf16.mxu1 %v779_v7  ;;  %v772_v11 = vld [vmem:[#allocation2 + $0x8] sm:$0xff]   ;;  %v773_v12 = vld [vmem:[#allocation2 + $0x10] sm:$0xff]   ;;  %v774_v13 = vld [vmem:[#allocation2 + $0x18] sm:$0xff]  }
  0x2a   :  { %724 = vmatpush3.bf16.msra.mxu1 %v779_v7  ;;  %v775_v14 = vld [vmem:[#allocation2 + $0x20] sm:$0xff]   ;;  %v776_v15 = vld [vmem:[#allocation2 + $0x28] sm:$0xff]   ;;  %v777_v16 = vld [vmem:[#allocation2 + $0x30] sm:$0xff]  }
  0x2b   :  { %694 = vmatpush3.bf16.msra.mxu0 %v764_v1  ;;  %725 = vmatprep.subr.bf16.mxu1 %v780_v8  ;;  %v778_v17 = vld [vmem:[#allocation2 + $0x38] sm:$0xff]   ;;  %v781_v18 = vld [vmem:[#allocation7 + $0x28] sm:$0xff]   ;;  %v782_v19 = vld [vmem:[#allocation7 + $0x20] sm:$0xff]  }
  0x2c   :  { %695 = vmatprep.subr.bf16.mxu0 %v765_v2  ;;  %v783_v20 = vld [vmem:[#allocation7 + $0x18] sm:$0xff]   ;;  %v784_v21 = vld [vmem:[#allocation7 + $0x10] sm:$0xff]   ;;  %v785_v22 = vld [vmem:[#allocation7 + $0x8] sm:$0xff]  }
  0x2d   :  { %v786_v23 = vld [vmem:[#allocation7] sm:$0xff]  }
  0x2e   :  { %726 = vmatpush3.bf16.msra.mxu1 %v780_v8  ;;  %v617_v25 = vld [vmem:[%s1045_s2] ss:$0 sm:$0xff] }
  0x2f   :  { %696 = vmatpush3.bf16.msra.mxu0 %v765_v2  ;;  %727 = vmatprep.subr.bf16.mxu1 %v781_v18 }
  0x30   :  { %697 = vmatprep.subr.bf16.mxu0 %v766_v3 }
  0x32   :  { %728 = vmatpush3.bf16.msra.mxu1 %v781_v18 }
  0x33   :  { %698 = vmatpush3.bf16.msra.mxu0 %v766_v3  ;;  %729 = vmatprep.subr.bf16.mxu1 %v782_v19 }
  0x34   :  { %699 = vmatprep.subr.bf16.mxu0 %v767_v5 }
  0x36   :  { %730 = vmatpush3.bf16.msra.mxu1 %v782_v19 }
  0x37   :  { %700 = vmatpush3.bf16.msra.mxu0 %v767_v5  ;;  %731 = vmatprep.subr.bf16.mxu1 %v783_v20 }
  0x38   :  { %701 = vmatprep.subr.bf16.mxu0 %v768_v6 }
  0x3a   :  { %732 = vmatpush3.bf16.msra.mxu1 %v783_v20 }
  0x3b   :  { %702 = vmatpush3.bf16.msra.mxu0 %v768_v6  ;;  %733 = vmatprep.subr.bf16.mxu1 %v784_v21 }
  0x3c   :  { %703 = vmatprep.subr.bf16.mxu0 %v769_v9 }
  0x3e   :  { %734 = vmatpush3.bf16.msra.mxu1 %v784_v21 }
  0x3f   :  { %704 = vmatpush3.bf16.msra.mxu0 %v769_v9  ;;  %735 = vmatprep.subr.bf16.mxu1 %v785_v22 }
  0x40   :  { %705 = vmatprep.subr.bf16.mxu0 %v770_v10 }
  0x42   :  { %736 = vmatpush3.bf16.msra.mxu1 %v785_v22 }
  0x43   :  { %706 = vmatpush3.bf16.msra.mxu0 %v770_v10  ;;  %737 = vmatprep.subr.bf16.mxu1 %v786_v23 }
  0x46   :  { %708 = vmatmul.mubr.bf16.vlgmr.msra.gmra.mxu0 %v772_v11  ;;  %738 = vmatpush3.bf16.msra.mxu1 %v786_v23 }
  0x47   :  { %711 = vmatprep.mubr.bf16.mxu0 %v773_v12 }
  0x4e   :  { %712 = vmatmul.mubr.bf16.gmra.mxu0 %v774_v13 }
  0x4f   :  { %715 = vmatprep.mubr.bf16.mxu0 %v775_v14 }
  0x56   :  { %716 = vmatmul.mubr.bf16.gmra.mxu0 %v776_v15 }
  0x57   :  { %719 = vmatprep.mubr.bf16.mxu0 %v777_v16 }
  0x5e   :  { %720 = vmatmul.mubr.bf16.gmra.mxu0 %v778_v17  ;;  %v1022_v17 = vld [vmem:[%s1047_s4] ss:$0 sm:$0xff]  ;;  %s974_s4 = smov [#allocation8]  }
  0x5f   :  { %s604_s10 = sshll.u32 %s974_s4, 4  ;;  %s605_s10 = int_to_ptr.vmem [resolvable:$true] %s604_s10 }
  0x60   :  { %s943_s11 = scalar_lea.vmem %s605_s10, 2048  ;;  %p948_p2 = scmp.lt.s32.totalorder %s605_s10, %s605_s10 }
  0x61   :  { %p944_p1 = scmp.ne.s32.totalorder %s605_s10, %s943_s11  ;;  %p949_p3 = scmp.lt.s32.totalorder %s943_s11, %s943_s11 }
  0x63   :  { %p950_p4 = por %p949_p3, %p948_p2 }
  0x65   :  { %p951_p5 = pnand %p950_p4, %p944_p1 }
 0x106   :  { %v709_v24 = vpop.f32.mrf.mxu0 }
 0x107   :  { %v241_v30 = vadd.f32 %v709_v24, %v617_v25 }
 0x108   :  { %v232_v26 = vpop.f32.mrf.mxu0 }
 0x109   :  { %v233_v27 = vadd.f32 %v617_v25, %v232_v26 }
 0x10a   :  { %v710_v28 = vpop.f32.mrf.mxu0 }
 0x10b   :  { %v244_v29 = vadd.f32 %v710_v28, %v617_v25  ;;  %787 = vtanh.f32 %v233_v27 }
 0x10c   :  { %v235_v31 = vpop.f32.mrf.mxu0 }
 0x10d   :  { %v236_v32 = vadd.f32 %v617_v25, %v235_v31  ;;  %789 = vtanh.f32 %v244_v29 }
 0x10e   :  { %v713_v33 = vpop.f32.mrf.mxu0 }
 0x10f   :  { %791 = vtanh.f32 %v236_v32  ;;  %v257_v38 = vadd.f32 %v713_v33, %v617_v25 }
 0x110   :  { %793 = vtanh.f32 %v241_v30  ;;  %v248_v34 = vpop.f32.mrf.mxu0 }
 0x111   :  { %v249_v35 = vadd.f32 %v617_v25, %v248_v34 }
 0x112   :  { %v714_v36 = vpop.f32.mrf.mxu0 }
 0x113   :  { %v260_v37 = vadd.f32 %v714_v36, %v617_v25  ;;  %795 = vtanh.f32 %v249_v35 }
 0x114   :  { %v251_v39 = vpop.f32.mrf.mxu0 }
 0x115   :  { %v252_v40 = vadd.f32 %v617_v25, %v251_v39  ;;  %797 = vtanh.f32 %v260_v37 }
 0x116   :  { %v717_v41 = vpop.f32.mrf.mxu0 }
 0x117   :  { %799 = vtanh.f32 %v252_v40  ;;  %v273_v49 = vadd.f32 %v717_v41, %v617_v25 }
 0x118   :  { %801 = vtanh.f32 %v257_v38  ;;  %v264_v42 = vpop.f32.mrf.mxu0  ;;  %v788_v44 = vpop.eup %787 }
 0x119   :  { %v265_v43 = vadd.f32 %v617_v25, %v264_v42 }
 0x11a   :  { %v718_v45 = vpop.f32.mrf.mxu0  ;;  %v790_v46 = vpop.eup %789 }
 0x11b   :  { %v276_v47 = vadd.f32 %v718_v45, %v617_v25  ;;  %803 = vtanh.f32 %v265_v43 }
 0x11c   :  { %v792_v48 = vpop.eup %791  ;;  %v267_v50 = vpop.f32.mrf.mxu0 }
 0x11d   :  { %v794_v51 = vpop.eup %793  ;;  %v268_v52 = vadd.f32 %v617_v25, %v267_v50  ;;  %v311_v53 = vpack.c.bf16 %v792_v48, %v788_v44  ;;  %805 = vtanh.f32 %v276_v47 }
 0x11e   :  { %v721_v54 = vpop.f32.mrf.mxu0  ;;  %v312_v55 = vpack.c.bf16 %v790_v46, %v794_v51 }
 0x11f   :  { %807 = vtanh.f32 %v268_v52  ;;  %739 = vmatprep.mubr.bf16.mxu1 %v311_v53  ;;  %v289_v63 = vadd.f32 %v721_v54, %v617_v25 }
 0x120   :  { %809 = vtanh.f32 %v273_v49  ;;  %v280_v56 = vpop.f32.mrf.mxu0  ;;  %740 = vmatmul.mubr.bf16.vlgmr.msra.gmra.mxu1 %v312_v55  ;;  %v796_v58 = vpop.eup %795 }
 0x121   :  { %v281_v57 = vadd.f32 %v617_v25, %v280_v56 }
 0x122   :  { %v722_v59 = vpop.f32.mrf.mxu0  ;;  %v798_v60 = vpop.eup %797 }
 0x123   :  { %v292_v61 = vadd.f32 %v722_v59, %v617_v25  ;;  %811 = vtanh.f32 %v281_v57 }
 0x124   :  { %v800_v62 = vpop.eup %799  ;;  %v283_v0 = vpop.f32.mrf.mxu0 }
 0x125   :  { %v802_v1 = vpop.eup %801  ;;  %v284_v2 = vadd.f32 %v617_v25, %v283_v0  ;;  %v313_v3 = vpack.c.bf16 %v800_v62, %v796_v58  ;;  %813 = vtanh.f32 %v292_v61 }
 0x126   :  { %v314_v4 = vpack.c.bf16 %v798_v60, %v802_v1 }
 0x127   :  { %815 = vtanh.f32 %v284_v2  ;;  %743 = vmatprep.mubr.bf16.mxu1 %v313_v3 }
 0x128   :  { %817 = vtanh.f32 %v289_v63  ;;  %744 = vmatmul.mubr.bf16.gmra.mxu1 %v314_v4  ;;  %v804_v5 = vpop.eup %803 }
 0x12a   :  { %v806_v6 = vpop.eup %805 }
 0x12c   :  { %v808_v7 = vpop.eup %807 }
 0x12d   :  { %v810_v8 = vpop.eup %809  ;;  %v315_v9 = vpack.c.bf16 %v808_v7, %v804_v5 }
 0x12e   :  { %v316_v10 = vpack.c.bf16 %v806_v6, %v810_v8 }
 0x12f   :  { %747 = vmatprep.mubr.bf16.mxu1 %v315_v9 }
 0x130   :  { %748 = vmatmul.mubr.bf16.gmra.mxu1 %v316_v10  ;;  %v812_v11 = vpop.eup %811 }
 0x132   :  { %v814_v12 = vpop.eup %813 }
 0x134   :  { %v816_v13 = vpop.eup %815 }
 0x135   :  { %v818_v14 = vpop.eup %817  ;;  %v317_v15 = vpack.c.bf16 %v816_v13, %v812_v11 }
 0x136   :  { %v318_v16 = vpack.c.bf16 %v814_v12, %v818_v14 }
 0x137   :  { %751 = vmatprep.mubr.bf16.mxu1 %v317_v15 }
 0x138   :  { %752 = vmatmul.mubr.bf16.gmra.mxu1 %v318_v16 }
 0x1e0   :  { %v741_v18 = vpop.f32.mrf.mxu1 }
 0x1e1   :  { %v433_v19 = vadd.f32 %v741_v18, %v1022_v17 }
 0x1e2   :  { %v424_v20 = vpop.f32.mrf.mxu1 }
 0x1e3   :  { %v645_v21 = vmul.f32 -1.442695, %v433_v19  ;;  %v425_v22 = vadd.f32 %v1022_v17, %v424_v20 }
 0x1e4   :  { %v742_v23 = vpop.f32.mrf.mxu1 }
 0x1e5   :  { %819 = vpow2.f32 %v645_v21  ;;  %v643_v24 = vmul.f32 -1.442695, %v425_v22  ;;  %v436_v25 = vadd.f32 %v742_v23, %v1022_v17 }
 0x1e6   :  { %v427_v26 = vpop.f32.mrf.mxu1 }
 0x1e7   :  { %821 = vpow2.f32 %v643_v24  ;;  %v646_v27 = vmul.f32 -1.442695, %v436_v25  ;;  %v428_v28 = vadd.f32 %v1022_v17, %v427_v26 }
 0x1e8   :  { %v745_v29 = vpop.f32.mrf.mxu1 }
 0x1e9   :  { %823 = vpow2.f32 %v646_v27  ;;  %v644_v30 = vmul.f32 -1.442695, %v428_v28  ;;  %v449_v31 = vadd.f32 %v745_v29, %v1022_v17 }
 0x1ea   :  { %v440_v32 = vpop.f32.mrf.mxu1 }
 0x1eb   :  { %825 = vpow2.f32 %v644_v30  ;;  %v649_v33 = vmul.f32 -1.442695, %v449_v31  ;;  %v441_v34 = vadd.f32 %v1022_v17, %v440_v32 }
 0x1ec   :  { %v746_v35 = vpop.f32.mrf.mxu1 }
 0x1ed   :  { %827 = vpow2.f32 %v649_v33  ;;  %v647_v36 = vmul.f32 -1.442695, %v441_v34  ;;  %v452_v37 = vadd.f32 %v746_v35, %v1022_v17 }
 0x1ee   :  { %v443_v38 = vpop.f32.mrf.mxu1 }
 0x1ef   :  { %829 = vpow2.f32 %v647_v36  ;;  %v650_v39 = vmul.f32 -1.442695, %v452_v37  ;;  %v444_v40 = vadd.f32 %v1022_v17, %v443_v38 }
 0x1f0   :  { %v749_v41 = vpop.f32.mrf.mxu1 }
 0x1f1   :  { %831 = vpow2.f32 %v650_v39  ;;  %v648_v42 = vmul.f32 -1.442695, %v444_v40  ;;  %v465_v43 = vadd.f32 %v749_v41, %v1022_v17 }
 0x1f2   :  { %v820_v44 = vpop.eup %819  ;;  %v456_v45 = vpop.f32.mrf.mxu1 }
 0x1f3   :  { %v537_v46 = vadd.f32 1.0, %v820_v44  ;;  %833 = vpow2.f32 %v648_v42  ;;  %v653_v47 = vmul.f32 -1.442695, %v465_v43  ;;  %v457_v48 = vadd.f32 %v1022_v17, %v456_v45 }
 0x1f4   :  { %v822_v49 = vpop.eup %821  ;;  %v750_v50 = vpop.f32.mrf.mxu1 }
 0x1f5   :  { %835 = vrcp.f32 %v537_v46  ;;  %v535_v51 = vadd.f32 1.0, %v822_v49  ;;  %v651_v52 = vmul.f32 -1.442695, %v457_v48  ;;  %v468_v53 = vadd.f32 %v750_v50, %v1022_v17 }
 0x1f6   :  { %v824_v54 = vpop.eup %823  ;;  %837 = vpow2.f32 %v653_v47  ;;  %v459_v55 = vpop.f32.mrf.mxu1 }
 0x1f7   :  { %839 = vrcp.f32 %v535_v51  ;;  %v538_v56 = vadd.f32 1.0, %v824_v54  ;;  %v654_v57 = vmul.f32 -1.442695, %v468_v53  ;;  %v460_v58 = vadd.f32 %v1022_v17, %v459_v55 }
 0x1f8   :  { %v826_v59 = vpop.eup %825  ;;  %841 = vpow2.f32 %v651_v52  ;;  %v753_v60 = vpop.f32.mrf.mxu1 }
 0x1f9   :  { %843 = vrcp.f32 %v538_v56  ;;  %v536_v61 = vadd.f32 1.0, %v826_v59  ;;  %v652_v62 = vmul.f32 -1.442695, %v460_v58  ;;  %v481_v63 = vadd.f32 %v753_v60, %v1022_v17 }
 0x1fa   :  { %v828_v0 = vpop.eup %827  ;;  %845 = vpow2.f32 %v654_v57  ;;  %v472_v1 = vpop.f32.mrf.mxu1 }
 0x1fb   :  { %847 = vrcp.f32 %v536_v61  ;;  %v541_v2 = vadd.f32 1.0, %v828_v0  ;;  %v657_v3 = vmul.f32 -1.442695, %v481_v63  ;;  %v473_v4 = vadd.f32 %v1022_v17, %v472_v1 }
 0x1fc   :  { %v830_v5 = vpop.eup %829  ;;  %849 = vpow2.f32 %v652_v62  ;;  %v754_v6 = vpop.f32.mrf.mxu1 }
 0x1fd   :  { %851 = vrcp.f32 %v541_v2  ;;  %v539_v7 = vadd.f32 1.0, %v830_v5  ;;  %v655_v8 = vmul.f32 -1.442695, %v473_v4  ;;  %v484_v9 = vadd.f32 %v754_v6, %v1022_v17 }
 0x1fe   :  { %v832_v10 = vpop.eup %831  ;;  %853 = vpow2.f32 %v657_v3  ;;  %v475_v11 = vpop.f32.mrf.mxu1 }
 0x1ff   :  { %855 = vrcp.f32 %v539_v7  ;;  %v542_v12 = vadd.f32 1.0, %v832_v10  ;;  %v658_v13 = vmul.f32 -1.442695, %v484_v9  ;;  %v476_v14 = vadd.f32 %v1022_v17, %v475_v11 }
 0x200   :  { %v834_v15 = vpop.eup %833  ;;  %857 = vpow2.f32 %v655_v8 }
 0x201   :  { %859 = vrcp.f32 %v542_v12  ;;  %v540_v16 = vadd.f32 1.0, %v834_v15  ;;  %v656_v18 = vmul.f32 -1.442695, %v476_v14 }
 0x202   :  { %v836_v19 = vpop.eup %835  ;;  %861 = vpow2.f32 %v658_v13 }
 0x203   :  { %v838_v20 = vpop.eup %837  ;;  %585 = vst [vmem:[#allocation8 + $0x10] sm:$0xff] %v836_v19  ;;  %863 = vrcp.f32 %v540_v16 }
 0x204   :  { %v840_v21 = vpop.eup %839  ;;  %v545_v22 = vadd.f32 1.0, %v838_v20  ;;  %865 = vpow2.f32 %v656_v18 }
 0x205   :  { %v842_v23 = vpop.eup %841  ;;  %583 = vst [vmem:[#allocation8] sm:$0xff] %v840_v21 }
 0x206   :  { %v844_v24 = vpop.eup %843  ;;  %867 = vrcp.f32 %v545_v22  ;;  %v543_v25 = vadd.f32 1.0, %v842_v23 }
 0x207   :  { %v846_v26 = vpop.eup %845  ;;  %586 = vst [vmem:[#allocation8 + $0x18] sm:$0xff] %v844_v24 }
 0x208   :  { %v848_v17 = vpop.eup %847  ;;  %869 = vrcp.f32 %v543_v25  ;;  %v546_v27 = vadd.f32 1.0, %v846_v26 }
 0x209   :  { %v850_v28 = vpop.eup %849  ;;  %584 = vst [vmem:[#allocation8 + $0x8] sm:$0xff] %v848_v17 }
 0x20a   :  { %v852_v29 = vpop.eup %851  ;;  %871 = vrcp.f32 %v546_v27  ;;  %v544_v30 = vadd.f32 1.0, %v850_v28 }
 0x20b   :  { %v854_v31 = vpop.eup %853  ;;  %589 = vst [vmem:[#allocation8 + $0x30] sm:$0xff] %v852_v29 }
 0x20c   :  { %v856_v32 = vpop.eup %855  ;;  %873 = vrcp.f32 %v544_v30  ;;  %v549_v33 = vadd.f32 1.0, %v854_v31 }
 0x20d   :  { %v858_v34 = vpop.eup %857  ;;  %587 = vst [vmem:[#allocation8 + $0x20] sm:$0xff] %v856_v32 }
 0x20e   :  { %v860_v35 = vpop.eup %859  ;;  %875 = vrcp.f32 %v549_v33  ;;  %v547_v36 = vadd.f32 1.0, %v858_v34 }
 0x20f   :  { %v862_v37 = vpop.eup %861  ;;  %590 = vst [vmem:[#allocation8 + $0x38] sm:$0xff] %v860_v35 }
 0x210   :  { %v864_v38 = vpop.eup %863  ;;  %877 = vrcp.f32 %v547_v36  ;;  %v550_v39 = vadd.f32 1.0, %v862_v37 }
 0x211   :  { %v866_v40 = vpop.eup %865  ;;  %588 = vst [vmem:[#allocation8 + $0x28] sm:$0xff] %v864_v38 }
 0x212   :  { %879 = vrcp.f32 %v550_v39  ;;  %v548_v41 = vadd.f32 1.0, %v866_v40 }
 0x213   :  { %v868_v42 = vpop.eup %867 }
 0x214   :  { %593 = vst [vmem:[#allocation8 + $0x50] sm:$0xff] %v868_v42  ;;  %881 = vrcp.f32 %v548_v41 }
 0x215   :  { %v870_v43 = vpop.eup %869 }
 0x216   :  { %591 = vst [vmem:[#allocation8 + $0x40] sm:$0xff] %v870_v43 }
 0x217   :  { %v872_v44 = vpop.eup %871 }
 0x218   :  { %594 = vst [vmem:[#allocation8 + $0x58] sm:$0xff] %v872_v44 }
 0x219   :  { %v874_v45 = vpop.eup %873 }
 0x21a   :  { %592 = vst [vmem:[#allocation8 + $0x48] sm:$0xff] %v874_v45 }
 0x21b   :  { %v876_v46 = vpop.eup %875 }
 0x21c   :  { %597 = vst [vmem:[#allocation8 + $0x70] sm:$0xff] %v876_v46 }
 0x21d   :  { %v878_v47 = vpop.eup %877 }
 0x21e   :  { %595 = vst [vmem:[#allocation8 + $0x60] sm:$0xff] %v878_v47 }
 0x21f   :  { %v880_v48 = vpop.eup %879 }
 0x220   :  { %598 = vst [vmem:[#allocation8 + $0x78] sm:$0xff] %v880_v48 }
 0x221   :  { %v882_v49 = vpop.eup %881 }
 0x222   :  { %596 = vst [vmem:[#allocation8 + $0x68] sm:$0xff] %v882_v49 }
 0x223   :  { %954 = shalt.err (!%p951_p5)
}
 0x224   :  { %s975_s12 = smov 128   ;;  %s976_s13 = smov 8  }
 0x225   :  { %610 = dma.vmem_to_hbm [thread:$0]  %s605_s10, 2048, %s1048_s5, [#allocation4], %s975_s12, %s975_s12, %s976_s13  }
 0x226   :  { %967 = dma.done.wait [#allocation4], 2048  }
 0x227   :  { %968 = vsyncadd [#allocation4], 4294965248 }
 0x228   :  { %614 = vsyncpa [#allocation3], 1 }
 0x229   :  { %615 = vsyncpa [#allocation6], 1 }
 0x22a   :  { %616 = vsyncpa [#allocation4], 1 }

</bundles_post_ra>
